<compile_context>
chip_gen: v7x
topology: tpu7x:2x2x1
jax: 0.10.0
libtpu: 0.0.40
codegen_flags: <defaults>
</compile_context>

<pallas_src>
import functools

import jax
import jax.numpy as jnp
from jax import lax
from jax.experimental import pallas as pl
from jax.experimental.pallas import tpu as pltpu


def _decoder_kernel(x_ref, w0_ref, w1_ref, wmu_ref,
                    mu_ref, c0_ref, c1_ref, c2_ref, c3_ref, *, inv_b):
    step = pl.program_id(0)

    @pl.when(step == 0)
    def _init():
        c0_ref[...] = jnp.zeros_like(c0_ref)
        c1_ref[...] = jnp.zeros_like(c1_ref)
        c2_ref[...] = jnp.zeros_like(c2_ref)
        c3_ref[...] = jnp.zeros_like(c3_ref)

    # (B_tile, F) x (B_tile, F) -> (F, F), contracting the batch dim of both
    # operands directly on the MXU (no explicit transpose).
    def gram(a):
        return lax.dot_general(a, a, (((0,), (0,)), ((), ())),
                               preferred_element_type=jnp.float32)

    # (B_tile, Fin) x (Fout, Fin) -> (B_tile, Fout)  ==  a @ W^T
    def linear(a, w):
        return lax.dot_general(a, w, (((1,), (1,)), ((), ())),
                               preferred_element_type=jnp.float32)

    x = x_ref[...]
    c0_ref[...] += gram(x) * inv_b

    h0 = jnp.maximum(linear(x, w0_ref[...]), 0.0)
    c1_ref[...] += gram(h0) * inv_b

    h1 = jnp.maximum(linear(h0, w1_ref[...]), 0.0)
    c2_ref[...] += gram(h1) * inv_b

    mu = linear(h1, wmu_ref[...])
    mu_ref[...] = mu
    c3_ref[...] += gram(mu) * inv_b


def base_decoder_forward(x, w0, w1, wmu, *, batch_tile=512):
    """Forward pass of BaseDecoder.

    x  : (B, z_dim) float32
    w0 : (h_dim, z_dim)   -- PyTorch nn.Linear weight layout (out, in)
    w1 : (h_dim, h_dim)
    wmu: (x_dim, h_dim)

    Returns (mu, (cov_x, cov_h0, cov_h1, cov_mu)).
    """
    B, z_dim = x.shape
    h_dim = w0.shape[0]
    x_dim = wmu.shape[0]

    # Batch tile: multiple of 8 sublanes, capped by batch_tile.
    bt = min(batch_tile, max(B, 8))
    bt = ((bt + 7) // 8) * 8
    b_pad = ((B + bt - 1) // bt) * bt
    if b_pad != B:
        # Zero rows are exact no-ops for every covariance and produce mu == 0.
        x = jnp.pad(x, ((0, b_pad - B), (0, 0)))
    n_tiles = b_pad // bt

    inv_b = 1.0 / float(B)  # mean over the ORIGINAL batch size

    out_shapes = (
        jax.ShapeDtypeStruct((b_pad, x_dim), jnp.float32),   # mu (padded)
        jax.ShapeDtypeStruct((z_dim, z_dim), jnp.float32),   # cov of x
        jax.ShapeDtypeStruct((h_dim, h_dim), jnp.float32),   # cov of h0
        jax.ShapeDtypeStruct((h_dim, h_dim), jnp.float32),   # cov of h1
        jax.ShapeDtypeStruct((x_dim, x_dim), jnp.float32),   # cov of mu
    )

    full2d = lambda r, c: pl.BlockSpec((r, c), lambda i: (0, 0))

    flops = 2 * b_pad * (z_dim * h_dim + h_dim * h_dim + h_dim * x_dim
                         + z_dim * z_dim + 2 * h_dim * h_dim + x_dim * x_dim)
    bytes_accessed = 4 * (b_pad * z_dim                       # x in
                          + h_dim * z_dim + h_dim * h_dim + x_dim * h_dim
                          + b_pad * x_dim                     # mu out
                          + z_dim * z_dim + 2 * h_dim * h_dim + x_dim * x_dim)

    mu, c0, c1, c2, c3 = pl.pallas_call(
        functools.partial(_decoder_kernel, inv_b=inv_b),
        out_shape=out_shapes,
        grid=(n_tiles,),
        in_specs=[
            pl.BlockSpec((bt, z_dim), lambda i: (i, 0)),   # x tile (pipelined)
            full2d(h_dim, z_dim),                          # W0 (resident)
            full2d(h_dim, h_dim),                          # W1 (resident)
            full2d(x_dim, h_dim),                          # Wmu (resident)
        ],
        out_specs=(
            pl.BlockSpec((bt, x_dim), lambda i: (i, 0)),   # mu per-tile
            full2d(z_dim, z_dim),                          # cov accumulators:
            full2d(h_dim, h_dim),                          # same block index
            full2d(h_dim, h_dim),                          # across the batch
            full2d(x_dim, x_dim),                          # axis -> resident
        ),
        compiler_params=pltpu.CompilerParams(
            dimension_semantics=("arbitrary",)),           # reduction axis
        cost_estimate=pl.CostEstimate(flops=flops, transcendentals=0,
                                      bytes_accessed=bytes_accessed),
    )(x, w0, w1, wmu)

    return mu[:B], (c0, c1, c2, c3)


def xavier_normal(key, out_f, in_f):
    std = (2.0 / (in_f + out_f)) ** 0.5
    return std * jax.random.normal(key, (out_f, in_f), dtype=jnp.float32)


if __name__ == "__main__":
    # small shapes consistent with the module: batch=8, z_dim=8, h_dim=32, x_dim=16
    B, z_dim, h_dim, x_dim = 8, 8, 32, 16

    key = jax.random.PRNGKey(0)
    kx, k0, k1, k2 = jax.random.split(key, 4)

    x = jax.random.normal(kx, (B, z_dim), dtype=jnp.float32)
    w0 = xavier_normal(k0, h_dim, z_dim)    # linear_hidden0.weight
    w1 = xavier_normal(k1, h_dim, h_dim)    # linear_hidden1.weight
    wmu = xavier_normal(k2, x_dim, h_dim)   # linear_mu.weight

    mu, covs = base_decoder_forward(x, w0, w1, wmu)
    jax.block_until_ready(mu)
    jax.block_until_ready(covs)

    # pure-JAX reference
    h0_r = jnp.maximum(x @ w0.T, 0.0)
    h1_r = jnp.maximum(h0_r @ w1.T, 0.0)
    mu_r = h1_r @ wmu.T
    refs = (
        jnp.einsum("bi,bj->ij", x, x) / B,
        jnp.einsum("bi,bj->ij", h0_r, h0_r) / B,
        jnp.einsum("bi,bj->ij", h1_r, h1_r) / B,
        jnp.einsum("bi,bj->ij", mu_r, mu_r) / B,
    )
    assert jnp.allclose(mu, mu_r, atol=1e-4, rtol=1e-4)
    for got, ref in zip(covs, refs):
        assert jnp.allclose(got, ref, atol=1e-4, rtol=1e-4)

    print("KERNEL_OK")
</pallas_src>

<mosaic_0001>
module attributes {stable_mosaic.version = 11 : i64} {
  func.func @_decoder_kernel(%arg0: i32, %arg1: memref<8x8xf32, #tpu.memory_space<vmem>>, %arg2: memref<32x8xf32, #tpu.memory_space<vmem>>, %arg3: memref<32x32xf32, #tpu.memory_space<vmem>>, %arg4: memref<16x32xf32, #tpu.memory_space<vmem>>, %arg5: memref<8x16xf32, #tpu.memory_space<vmem>>, %arg6: memref<8x8xf32, #tpu.memory_space<vmem>>, %arg7: memref<32x32xf32, #tpu.memory_space<vmem>>, %arg8: memref<32x32xf32, #tpu.memory_space<vmem>>, %arg9: memref<16x16xf32, #tpu.memory_space<vmem>>) attributes {dimension_semantics = [#tpu.dimension_semantics<arbitrary>], iteration_bounds = array<i64: 1>, scalar_prefetch = 0 : i64, scratch_operands = 0 : i64, tpu.core_type = #tpu.core_type<tc>, window_params = [{transform_indices = @transform_0, window_bounds = array<i64: 8, 8>}, {pipeline_mode = #tpu.pipeline_mode<synchronous>, transform_indices = @transform_1, window_bounds = array<i64: 32, 8>}, {pipeline_mode = #tpu.pipeline_mode<synchronous>, transform_indices = @transform_2, window_bounds = array<i64: 32, 32>}, {pipeline_mode = #tpu.pipeline_mode<synchronous>, transform_indices = @transform_3, window_bounds = array<i64: 16, 32>}, {transform_indices = @transform_4, window_bounds = array<i64: 8, 16>}, {pipeline_mode = #tpu.pipeline_mode<synchronous>, transform_indices = @transform_5, window_bounds = array<i64: 8, 8>}, {pipeline_mode = #tpu.pipeline_mode<synchronous>, transform_indices = @transform_6, window_bounds = array<i64: 32, 32>}, {pipeline_mode = #tpu.pipeline_mode<synchronous>, transform_indices = @transform_7, window_bounds = array<i64: 32, 32>}, {pipeline_mode = #tpu.pipeline_mode<synchronous>, transform_indices = @transform_8, window_bounds = array<i64: 16, 16>}]} {
    %c0_i32 = arith.constant 0 : i32
    %0 = arith.cmpi eq, %arg0, %c0_i32 : i32
    %1 = arith.extui %0 : i1 to i32
    %c0_i32_0 = arith.constant 0 : i32
    %2 = arith.cmpi ne, %1, %c0_i32_0 : i32
    scf.if %2 {
      %cst_38 = arith.constant 0.000000e+00 : f32
      %39 = vector.broadcast %cst_38 : f32 to vector<8x8xf32>
      %c0_39 = arith.constant 0 : index
      %c0_40 = arith.constant 0 : index
      %40 = vector.load %arg6[%c0_39, %c0_40] : memref<8x8xf32, #tpu.memory_space<vmem>>, vector<8x8xf32>
      tpu.vector_store %arg6[%c0_39, %c0_40], %39 {strides = array<i32>} : memref<8x8xf32, #tpu.memory_space<vmem>>, vector<8x8xf32>,
      %cst_41 = arith.constant 0.000000e+00 : f32
      %41 = vector.broadcast %cst_41 : f32 to vector<32x32xf32>
      %c0_42 = arith.constant 0 : index
      %c0_43 = arith.constant 0 : index
      %42 = vector.load %arg7[%c0_42, %c0_43] : memref<32x32xf32, #tpu.memory_space<vmem>>, vector<32x32xf32>
      tpu.vector_store %arg7[%c0_42, %c0_43], %41 {strides = array<i32>} : memref<32x32xf32, #tpu.memory_space<vmem>>, vector<32x32xf32>,
      %cst_44 = arith.constant 0.000000e+00 : f32
      %43 = vector.broadcast %cst_44 : f32 to vector<32x32xf32>
      %c0_45 = arith.constant 0 : index
      %c0_46 = arith.constant 0 : index
      %44 = vector.load %arg8[%c0_45, %c0_46] : memref<32x32xf32, #tpu.memory_space<vmem>>, vector<32x32xf32>
      tpu.vector_store %arg8[%c0_45, %c0_46], %43 {strides = array<i32>} : memref<32x32xf32, #tpu.memory_space<vmem>>, vector<32x32xf32>,
      %cst_47 = arith.constant 0.000000e+00 : f32
      %45 = vector.broadcast %cst_47 : f32 to vector<16x16xf32>
      %c0_48 = arith.constant 0 : index
      %c0_49 = arith.constant 0 : index
      %46 = vector.load %arg9[%c0_48, %c0_49] : memref<16x16xf32, #tpu.memory_space<vmem>>, vector<16x16xf32>
      tpu.vector_store %arg9[%c0_48, %c0_49], %45 {strides = array<i32>} : memref<16x16xf32, #tpu.memory_space<vmem>>, vector<16x16xf32>,
    } else {
    }
    %c0 = arith.constant 0 : index
    %c0_1 = arith.constant 0 : index
    %3 = vector.load %arg1[%c0, %c0_1] : memref<8x8xf32, #tpu.memory_space<vmem>>, vector<8x8xf32>
    %c0_2 = arith.constant 0 : index
    %c0_3 = arith.constant 0 : index
    %4 = vector.load %arg6[%c0_2, %c0_3] : memref<8x8xf32, #tpu.memory_space<vmem>>, vector<8x8xf32>
    %cst = arith.constant dense<0.000000e+00> : vector<8x8xf32>
    %5 = tpu.matmul %3, %3, %cst {dimension_numbers = #tpu.dot_dimension_numbers<[0], [0], [1], [1], [0, 1, 1, 1], [], []>} : vector<8x8xf32>, vector<8x8xf32>, vector<8x8xf32> -> vector<8x8xf32>
    %cst_4 = arith.constant 1.250000e-01 : f32
    %6 = vector.broadcast %cst_4 : f32 to vector<8x8xf32>
    %7 = arith.mulf %5, %6 : vector<8x8xf32>
    %8 = arith.addf %4, %7 : vector<8x8xf32>
    %c0_5 = arith.constant 0 : index
    %c0_6 = arith.constant 0 : index
    %9 = vector.load %arg6[%c0_5, %c0_6] : memref<8x8xf32, #tpu.memory_space<vmem>>, vector<8x8xf32>
    tpu.vector_store %arg6[%c0_5, %c0_6], %8 {strides = array<i32>} : memref<8x8xf32, #tpu.memory_space<vmem>>, vector<8x8xf32>,
    %c0_7 = arith.constant 0 : index
    %c0_8 = arith.constant 0 : index
    %10 = vector.load %arg2[%c0_7, %c0_8] : memref<32x8xf32, #tpu.memory_space<vmem>>, vector<32x8xf32>
    %cst_9 = arith.constant dense<0.000000e+00> : vector<8x32xf32>
    %11 = tpu.matmul %3, %10, %cst_9 {dimension_numbers = #tpu.dot_dimension_numbers<[1], [1], [0], [0], [0, 0, 1, 0], [], []>} : vector<8x8xf32>, vector<32x8xf32>, vector<8x32xf32> -> vector<8x32xf32>
    %cst_10 = arith.constant 0.000000e+00 : f32
    %12 = vector.broadcast %cst_10 : f32 to vector<8x32xf32>
    %13 = arith.maximumf %11, %12 : vector<8x32xf32>
    %c0_11 = arith.constant 0 : index
    %c0_12 = arith.constant 0 : index
    %14 = vector.load %arg7[%c0_11, %c0_12] : memref<32x32xf32, #tpu.memory_space<vmem>>, vector<32x32xf32>
    %cst_13 = arith.constant dense<0.000000e+00> : vector<32x32xf32>
    %15 = tpu.matmul %13, %13, %cst_13 {dimension_numbers = #tpu.dot_dimension_numbers<[0], [0], [1], [1], [0, 1, 1, 1], [], []>} : vector<8x32xf32>, vector<8x32xf32>, vector<32x32xf32> -> vector<32x32xf32>
    %cst_14 = arith.constant 1.250000e-01 : f32
    %16 = vector.broadcast %cst_14 : f32 to vector<32x32xf32>
    %17 = arith.mulf %15, %16 : vector<32x32xf32>
    %18 = arith.addf %14, %17 : vector<32x32xf32>
    %c0_15 = arith.constant 0 : index
    %c0_16 = arith.constant 0 : index
    %19 = vector.load %arg7[%c0_15, %c0_16] : memref<32x32xf32, #tpu.memory_space<vmem>>, vector<32x32xf32>
    tpu.vector_store %arg7[%c0_15, %c0_16], %18 {strides = array<i32>} : memref<32x32xf32, #tpu.memory_space<vmem>>, vector<32x32xf32>,
    %c0_17 = arith.constant 0 : index
    %c0_18 = arith.constant 0 : index
    %20 = vector.load %arg3[%c0_17, %c0_18] : memref<32x32xf32, #tpu.memory_space<vmem>>, vector<32x32xf32>
    %cst_19 = arith.constant dense<0.000000e+00> : vector<8x32xf32>
    %21 = tpu.matmul %13, %20, %cst_19 {dimension_numbers = #tpu.dot_dimension_numbers<[1], [1], [0], [0], [0, 0, 1, 0], [], []>} : vector<8x32xf32>, vector<32x32xf32>, vector<8x32xf32> -> vector<8x32xf32>
    %cst_20 = arith.constant 0.000000e+00 : f32
    %22 = vector.broadcast %cst_20 : f32 to vector<8x32xf32>
    %23 = arith.maximumf %21, %22 : vector<8x32xf32>
    %c0_21 = arith.constant 0 : index
    %c0_22 = arith.constant 0 : index
    %24 = vector.load %arg8[%c0_21, %c0_22] : memref<32x32xf32, #tpu.memory_space<vmem>>, vector<32x32xf32>
    %cst_23 = arith.constant dense<0.000000e+00> : vector<32x32xf32>
    %25 = tpu.matmul %23, %23, %cst_23 {dimension_numbers = #tpu.dot_dimension_numbers<[0], [0], [1], [1], [0, 1, 1, 1], [], []>} : vector<8x32xf32>, vector<8x32xf32>, vector<32x32xf32> -> vector<32x32xf32>
    %cst_24 = arith.constant 1.250000e-01 : f32
    %26 = vector.broadcast %cst_24 : f32 to vector<32x32xf32>
    %27 = arith.mulf %25, %26 : vector<32x32xf32>
    %28 = arith.addf %24, %27 : vector<32x32xf32>
    %c0_25 = arith.constant 0 : index
    %c0_26 = arith.constant 0 : index
    %29 = vector.load %arg8[%c0_25, %c0_26] : memref<32x32xf32, #tpu.memory_space<vmem>>, vector<32x32xf32>
    tpu.vector_store %arg8[%c0_25, %c0_26], %28 {strides = array<i32>} : memref<32x32xf32, #tpu.memory_space<vmem>>, vector<32x32xf32>,
    %c0_27 = arith.constant 0 : index
    %c0_28 = arith.constant 0 : index
    %30 = vector.load %arg4[%c0_27, %c0_28] : memref<16x32xf32, #tpu.memory_space<vmem>>, vector<16x32xf32>
    %cst_29 = arith.constant dense<0.000000e+00> : vector<8x16xf32>
    %31 = tpu.matmul %23, %30, %cst_29 {dimension_numbers = #tpu.dot_dimension_numbers<[1], [1], [0], [0], [0, 0, 1, 0], [], []>} : vector<8x32xf32>, vector<16x32xf32>, vector<8x16xf32> -> vector<8x16xf32>
    %c0_30 = arith.constant 0 : index
    %c0_31 = arith.constant 0 : index
    %32 = vector.load %arg5[%c0_30, %c0_31] : memref<8x16xf32, #tpu.memory_space<vmem>>, vector<8x16xf32>
    tpu.vector_store %arg5[%c0_30, %c0_31], %31 {strides = array<i32>} : memref<8x16xf32, #tpu.memory_space<vmem>>, vector<8x16xf32>,
    %c0_32 = arith.constant 0 : index
    %c0_33 = arith.constant 0 : index
    %33 = vector.load %arg9[%c0_32, %c0_33] : memref<16x16xf32, #tpu.memory_space<vmem>>, vector<16x16xf32>
    %cst_34 = arith.constant dense<0.000000e+00> : vector<16x16xf32>
    %34 = tpu.matmul %31, %31, %cst_34 {dimension_numbers = #tpu.dot_dimension_numbers<[0], [0], [1], [1], [0, 1, 1, 1], [], []>} : vector<8x16xf32>, vector<8x16xf32>, vector<16x16xf32> -> vector<16x16xf32>
    %cst_35 = arith.constant 1.250000e-01 : f32
    %35 = vector.broadcast %cst_35 : f32 to vector<16x16xf32>
    %36 = arith.mulf %34, %35 : vector<16x16xf32>
    %37 = arith.addf %33, %36 : vector<16x16xf32>
    %c0_36 = arith.constant 0 : index
    %c0_37 = arith.constant 0 : index
    %38 = vector.load %arg9[%c0_36, %c0_37] : memref<16x16xf32, #tpu.memory_space<vmem>>, vector<16x16xf32>
    tpu.vector_store %arg9[%c0_36, %c0_37], %37 {strides = array<i32>} : memref<16x16xf32, #tpu.memory_space<vmem>>, vector<16x16xf32>,
    return
  }
  func.func @transform_0(%arg0: i32) -> (i32, i32) {
    %c0_i32 = arith.constant 0 : i32
    %c0_i32_0 = arith.constant 0 : i32
    return %arg0, %c0_i32 : i32, i32
  }
  func.func @transform_1(%arg0: i32) -> (i32, i32) {
    %c0_i32 = arith.constant 0 : i32
    %c0_i32_0 = arith.constant 0 : i32
    %c0_i32_1 = arith.constant 0 : i32
    return %c0_i32, %c0_i32_0 : i32, i32
  }
  func.func @transform_2(%arg0: i32) -> (i32, i32) {
    %c0_i32 = arith.constant 0 : i32
    %c0_i32_0 = arith.constant 0 : i32
    %c0_i32_1 = arith.constant 0 : i32
    return %c0_i32, %c0_i32_0 : i32, i32
  }
  func.func @transform_3(%arg0: i32) -> (i32, i32) {
    %c0_i32 = arith.constant 0 : i32
    %c0_i32_0 = arith.constant 0 : i32
    %c0_i32_1 = arith.constant 0 : i32
    return %c0_i32, %c0_i32_0 : i32, i32
  }
  func.func @transform_4(%arg0: i32) -> (i32, i32) {
    %c0_i32 = arith.constant 0 : i32
    %c0_i32_0 = arith.constant 0 : i32
    return %arg0, %c0_i32 : i32, i32
  }
  func.func @transform_5(%arg0: i32) -> (i32, i32) {
    %c0_i32 = arith.constant 0 : i32
    %c0_i32_0 = arith.constant 0 : i32
    %c0_i32_1 = arith.constant 0 : i32
    return %c0_i32, %c0_i32_0 : i32, i32
  }
  func.func @transform_6(%arg0: i32) -> (i32, i32) {
    %c0_i32 = arith.constant 0 : i32
    %c0_i32_0 = arith.constant 0 : i32
    %c0_i32_1 = arith.constant 0 : i32
    return %c0_i32, %c0_i32_0 : i32, i32
  }
  func.func @transform_7(%arg0: i32) -> (i32, i32) {
    %c0_i32 = arith.constant 0 : i32
    %c0_i32_0 = arith.constant 0 : i32
    %c0_i32_1 = arith.constant 0 : i32
    return %c0_i32, %c0_i32_0 : i32, i32
  }
  func.func @transform_8(%arg0: i32) -> (i32, i32) {
    %c0_i32 = arith.constant 0 : i32
    %c0_i32_0 = arith.constant 0 : i32
    %c0_i32_1 = arith.constant 0 : i32
    return %c0_i32, %c0_i32_0 : i32, i32
  }
}

</mosaic_0001>

<bundles_post_ra>
// kernel: tpu_custom_call.1
= control target key start
LH: loop header
LB: loop body
LE: loop exit
PB: predicated region body
PF: predicated region fallthrough
CT: control target
= control target key end

     0   :  { %14 = vsyncpa [#allocation3], 0  ;;  %s1444_s0 = inlined_call_operand.hbm [shape: f32[8,8], index: 0, kind: input, shape index: {}]   ;;  %s1445_s1 = inlined_call_operand.vmem [shape: f32[32,8], index: 1, kind: input, shape index: {}]   ;;  %s1446_s2 = inlined_call_operand.vmem [shape: f32[32,32], index: 2, kind: input, shape index: {}]   ;;  %s1447_s3 = inlined_call_operand.vmem [shape: f32[16,32], index: 3, kind: input, shape index: {}]   ;;  %s1448_s4 = inlined_call_operand.hbm [shape: f32[8,16], index: 4, kind: output, shape index: {0}]   ;;  %s1449_s5 = inlined_call_operand.hbm [shape: f32[8,8], index: 5, kind: output, shape index: {1}]   ;;  %s1450_s6 = inlined_call_operand.hbm [shape: f32[32,32], index: 6, kind: output, shape index: {2}]   ;;  %s1451_s7 = inlined_call_operand.hbm [shape: f32[32,32], index: 7, kind: output, shape index: {3}]   ;;  %s1452_s8 = inlined_call_operand.hbm [shape: f32[16,16], index: 8, kind: output, shape index: {4}]  }
   0x1   :  { %15 = vsyncpa [#allocation4], 0 }
   0x2   :  { %16 = vsyncpa [#allocation7], 0 }
   0x3   :  { %17 = vsyncpa [#allocation10], 0  ;;  %s1194_s27 = smov [#allocation2]   ;;  %s1054_s9 = scalar_lea.hbm %s1444_s0, 128 }
   0x4   :  { %s24_s28 = sshll.u32 %s1194_s27, 4  ;;  %p1055_p0 = scmp.ne.s32.totalorder %s1444_s0, %s1054_s9  ;;  %s25_s28 = int_to_ptr.vmem [resolvable:$true] %s24_s28 }
   0x5   :  { %p1058_p1 = scmp.lt.u32.totalorder %s1054_s9, %s1444_s0 }
   0x7   :  { %p1060_p2 = pnand %p1058_p1, %p1055_p0 }
   0x9   :  { %1063 = shalt.err (!%p1060_p2)
}
   0xa   :  { %s1064_s14 = scalar_lea.vmem %s25_s28, 128  ;;  %p1069_p4 = scmp.lt.s32.totalorder %s25_s28, %s25_s28 }
   0xb   :  { %p1065_p3 = scmp.ne.s32.totalorder %s25_s28, %s1064_s14  ;;  %p1070_p5 = scmp.lt.s32.totalorder %s1064_s14, %s1064_s14 }
   0xd   :  { %p1071_p6 = por %p1070_p5, %p1069_p4 }
   0xf   :  { %p1072_p7 = pnand %p1071_p6, %p1065_p3 }
  0x11   :  { %1075 = shalt.err (!%p1072_p7)
}
  0x12   :  { %27 = dma.hbm_to_vmem [thread:$0]  %s1444_s0, 128, %s25_s28, [#allocation3]  }
  0x13   :  { %1186 = dma.done.wait [#allocation3], 128  }
  0x14   :  { %1187 = vsyncadd [#allocation3], 4294967168  ;;  %vm41_vm0 = vcmask 64512   ;;  %v1195_v0 = vmov 0.0|0.0   ;;  %vm1196_vm1 = vmmov 0   ;;  %v1197_v1 = vmov 0.0  }
  0x15   :  { %1023 = vmatprep.subr.bf16.mxu1 %v1195_v0  ;;  %981 = vmatprep.mubr.msk.f32.mxu1 %vm1196_vm1, %v1197_v1  ;;  %42 = vst.msk [vmem:[#allocation6] sm:$0xff] %vm41_vm0, %v1197_v1  ;;  %v166_v2 = vld [vmem:[%s1445_s1] sm:$0xff]  ;;  %v167_v3 = vld [vmem:[%s1445_s1 + $0x8] sm:$0xff]  ;;  %vm1025_vm2 = vmpackc.low %vm41_vm0, %vm41_vm0  ;;  %vm43_vm3 = vcmask 261120   ;;  %vm52_vm5 = vcmask 130048   ;;  %s1199_s13 = smov [#allocation9]  }
  0x16   :  { %968 = vmatprep.subr.mxu0 %v1197_v1  ;;  %970 = vmatprep.mubr.msk.f32.mxu0 %vm1196_vm1, %v1197_v1  ;;  %v1024_v4 = vpack.c.bf16 %v167_v3, %v166_v2  ;;  %v55_v5 = vld [vmem:[#allocation2] sm:$0xff]  ;;  %v168_v6 = vld [vmem:[%s1445_s1 + $0x10] sm:$0xff]  ;;  %v169_v7 = vld [vmem:[%s1445_s1 + $0x18] sm:$0xff]  ;;  %44 = vst.msk [vmem:[#allocation8] sm:$0xff] %vm43_vm3, %v1197_v1  ;;  %s878_s14 = sshll.u32 %s1199_s13, 4  ;;  %s879_s14 = int_to_ptr.vmem [resolvable:$true] %s878_s14 }
  0x17   :  { %57 = vxpose.xlu0.b32.start.end [1/1] (short) (narrow) %v55_v5, 8  ;;  %969 = vmatpush3.msra.mxu0 %v55_v5  ;;  %v1028_v8 = vpack.c.bf16 %v169_v7, %v168_v6  ;;  %45 = vst.msk [vmem:[#allocation8 + $0x8] sm:$0xff] %vm43_vm3, %v1197_v1  ;;  %46 = vst.msk [vmem:[#allocation8 + $0x10] sm:$0xff] %vm43_vm3, %v1197_v1  ;;  %v402_v18 = vld [vmem:[%s1446_s2] sm:$0xff]  ;;  %v403_v19 = vld [vmem:[%s1446_s2 + $0x8] sm:$0xff] }
  0x18   :  { %1026 = vmatpush3.bf16.xpose.msk.msra.mxu1 %vm1025_vm2, %v1024_v4  ;;  %47 = vst.msk [vmem:[#allocation8 + $0x18] sm:$0xff] %vm43_vm3, %v1197_v1  ;;  %48 = vst.msk [vmem:[#allocation9] sm:$0xff] %vm43_vm3, %v1197_v1  ;;  %v1032_v21 = vpack.c.bf16 %v403_v19, %v402_v18  ;;  %v404_v24 = vld [vmem:[%s1446_s2 + $0x10] sm:$0xff]  ;;  %v405_v25 = vld [vmem:[%s1446_s2 + $0x18] sm:$0xff] }
  0x19   :  { %1027 = vmatprep.subr.bf16.mxu1 %v1195_v0  ;;  %49 = vst.msk [vmem:[#allocation9 + $0x8] sm:$0xff] %vm43_vm3, %v1197_v1  ;;  %50 = vst.msk [vmem:[#allocation9 + $0x10] sm:$0xff] %vm43_vm3, %v1197_v1  ;;  %v1036_v27 = vpack.c.bf16 %v405_v25, %v404_v24  ;;  %v637_v48 = vld [vmem:[%s1447_s3] sm:$0xff]  ;;  %v638_v49 = vld [vmem:[%s1447_s3 + $0x8] sm:$0xff]  ;;  %s1198_s3 = smov [#allocation6]  }
  0x1a   :  { %51 = vst.msk [vmem:[#allocation9 + $0x18] sm:$0xff] %vm43_vm3, %v1197_v1  ;;  %vm1314_vm4 = vmpackc.low %vm43_vm3, %vm43_vm3  ;;  %v1040_v51 = vpack.c.bf16 %v638_v49, %v637_v48  ;;  %s857_s12 = sshll.u32 %s1198_s3, 4  ;;  %s858_s12 = int_to_ptr.vmem [resolvable:$true] %s857_s12 }
  0x1b   :  { %54 = vst.msk [vmem:[#allocation11 + $0x8] sm:$0xff] %vm52_vm5, %v1197_v1  ;;  %53 = vst.msk [vmem:[#allocation11] sm:$0xff] %vm52_vm5, %v1197_v1  ;;  %s1076_s15 = scalar_lea.vmem %s858_s12, 128  ;;  %p1081_p9 = scmp.lt.s32.totalorder %s858_s12, %s858_s12 }
  0x1c   :  { %v56_v13 = vld [vmem:[#allocation6] sm:$0xff]  ;;  %p1077_p8 = scmp.ne.s32.totalorder %s858_s12, %s1076_s15  ;;  %p1082_p10 = scmp.lt.s32.totalorder %s1076_s15, %s1076_s15 }
  0x1d   :  { %v256_v32 = vld [vmem:[#allocation8] sm:$0xff] }
  0x1e   :  { %v257_v29 = vld [vmem:[#allocation8 + $0x8] sm:$0xff]  ;;  %v258_v40 = vld [vmem:[#allocation8 + $0x10] sm:$0xff]  ;;  %p1083_p11 = por %p1082_p10, %p1081_p9 }
  0x1f   :  { %v259_v37 = vld [vmem:[#allocation8 + $0x18] sm:$0xff]  ;;  %v492_v58 = vld [vmem:[#allocation9] sm:$0xff] }
  0x20   :  { %1030 = vmatpush3.bf16.xpose.msk.msra.mxu1 %vm1025_vm2, %v1028_v8  ;;  %v493_v55 = vld [vmem:[#allocation9 + $0x8] sm:$0xff]  ;;  %v494_v3 = vld [vmem:[#allocation9 + $0x10] sm:$0xff]  ;;  %p1084_p12 = pnand %p1083_p11, %p1077_p8 }
  0x21   :  { %v495_v63 = vld [vmem:[#allocation9 + $0x18] sm:$0xff] }
  0x27   :  { %982 = vmatmul.mubr.msk.f32.vlgmr.msra.gmra.mrb[0].mxu1 %vm41_vm0, %v55_v5 }
  0x97   :  { %v73_v9 = vpop.trf.xlu0 }
  0x98   :  { %971 = vmatmul.mubr.msk.f32.vlgmr.msra.gmra.mrb[0].mxu0 %vm41_vm0, %v73_v9 }
  0xfa   :  { %v251_v10 = vpop.f32.mrb[0].mxu1 }
  0xfb   :  { %v255_v11 = vmax.f32 %v251_v10, 0.0  ;;  %v983_v12 = vpop.f32.mrb[1].mxu1 }
  0xfd   :  { %260 = vxpose.xlu0.b32.start.end [1/1] (short) (narrow) %v255_v11, 32  ;;  %984 = vmatprep.subr.mxu0 %v255_v11 }
  0xfe   :  { %985 = vmatpush3.msra.mxu0 %v255_v11 }
  0xff   :  { %1031 = vmatprep.subr.bf16.mxu0 %v1195_v0 }
 0x16b   :  { %v159_v14 = vpop.f32.mrb[0].mxu0 }
 0x16c   :  { %v163_v15 = vmul.f32 0.125, %v159_v14  ;;  %v972_v16 = vpop.f32.mrb[1].mxu0 }
 0x16e   :  { %v164_v17 = vadd.f32 %v163_v15, %v56_v13 }
 0x170   :  { %165 = vst.msk [vmem:[#allocation6] sm:$0xff] %vm41_vm0, %v164_v17 }
 0x17d   :  { %v276_v20 = vpop.trf.xlu0 }
 0x17e   :  { %986 = vmatprep.mubr.msk.f32.mxu0 %vm41_vm0, %v276_v20 }
 0x181   :  { %v277_v23 = vpop.trf.xlu0 }
 0x182   :  { %987 = vmatmul.mubr.msk.f32.vlgmr.msra.gmra.mrb[2].mxu0 %vm41_vm0, %v277_v23 }
 0x183   :  { %1034 = vmatpush3.bf16.xpose.msk.msra.mxu0 %vm1314_vm4, %v1032_v21 }
 0x184   :  { %1035 = vmatprep.subr.bf16.mxu0 %v1195_v0 }
 0x185   :  { %v278_v26 = vpop.trf.xlu0 }
 0x186   :  { %989 = vmatprep.mubr.msk.f32.mxu0 %vm41_vm0, %v278_v26 }
 0x189   :  { %v279_v28 = vpop.trf.xlu0 }
 0x18a   :  { %990 = vmatmul.mubr.msk.f32.gmra.mrb[4].mxu0 %vm41_vm0, %v279_v28 }
 0x18b   :  { %1038 = vmatpush3.bf16.xpose.msk.msra.mxu0 %vm1314_vm4, %v1036_v27  ;;  %1000 = vmatprep.mubr.msk.f32.mxu0 %vm1196_vm1, %v1197_v1 }
 0x192   :  { %1001 = vmatmul.mubr.msk.f32.vlgmr.msra.gmra.mrb[6].mxu0 %vm43_vm3, %v255_v11 }
 0x255   :  { %v988_v30 = vpop.f32.mrb[2].mxu0 }
 0x256   :  { %v390_v31 = vmul.f32 0.125, %v988_v30  ;;  %v370_v33 = vpop.f32.mrb[3].mxu0 }
 0x257   :  { %v389_v34 = vmul.f32 0.125, %v370_v33 }
 0x258   :  { %v394_v35 = vadd.f32 %v390_v31, %v257_v29 }
 0x259   :  { %v393_v36 = vadd.f32 %v389_v34, %v256_v32 }
 0x25a   :  { %399 = vst.msk [vmem:[#allocation8 + $0x8] sm:$0xff] %vm43_vm3, %v394_v35 }
 0x25b   :  { %398 = vst.msk [vmem:[#allocation8] sm:$0xff] %vm43_vm3, %v393_v36 }
 0x25d   :  { %v991_v38 = vpop.f32.mrb[4].mxu0 }
 0x25e   :  { %v392_v39 = vmul.f32 0.125, %v991_v38  ;;  %v380_v41 = vpop.f32.mrb[5].mxu0 }
 0x25f   :  { %v391_v42 = vmul.f32 0.125, %v380_v41 }
 0x260   :  { %v396_v43 = vadd.f32 %v392_v39, %v259_v37 }
 0x261   :  { %v395_v44 = vadd.f32 %v391_v42, %v258_v40 }
 0x262   :  { %401 = vst.msk [vmem:[#allocation8 + $0x18] sm:$0xff] %vm43_vm3, %v396_v43 }
 0x263   :  { %400 = vst.msk [vmem:[#allocation8 + $0x10] sm:$0xff] %vm43_vm3, %v395_v44 }
 0x265   :  { %v487_v45 = vpop.f32.mrb[6].mxu0 }
 0x266   :  { %v491_v46 = vmax.f32 %v487_v45, 0.0  ;;  %v1002_v47 = vpop.f32.mrb[7].mxu0 }
 0x268   :  { %496 = vxpose.xlu1.b32.start.end [1/1] (short) (narrow) %v491_v46, 32  ;;  %1003 = vmatprep.subr.mxu1 %v491_v46 }
 0x269   :  { %1004 = vmatpush3.msra.mxu1 %v491_v46 }
 0x26a   :  { %1039 = vmatprep.subr.bf16.mxu1 %v1195_v0 }
 0x2e8   :  { %v512_v50 = vpop.trf.xlu1 }
 0x2e9   :  { %1005 = vmatprep.mubr.msk.f32.mxu1 %vm41_vm0, %v512_v50 }
 0x2ec   :  { %v513_v52 = vpop.trf.xlu1 }
 0x2ed   :  { %1006 = vmatmul.mubr.msk.f32.vlgmr.msra.gmra.mrb[2].mxu1 %vm41_vm0, %v513_v52 }
 0x2ee   :  { %1042 = vmatpush3.bf16.xpose.msk.msra.mxu1 %vm1314_vm4, %v1040_v51 }
 0x2f0   :  { %v514_v53 = vpop.trf.xlu1 }
 0x2f1   :  { %1008 = vmatprep.mubr.msk.f32.mxu1 %vm41_vm0, %v514_v53 }
 0x2f4   :  { %v515_v54 = vpop.trf.xlu1 }
 0x2f5   :  { %1009 = vmatmul.mubr.msk.f32.gmra.mrb[4].mxu1 %vm41_vm0, %v515_v54 }
 0x2f6   :  { %1015 = vmatprep.mubr.msk.f32.mxu1 %vm1196_vm1, %v1197_v1 }
 0x2f9   :  { %1016 = vmatmul.mubr.msk.f32.vlgmr.msra.gmra.mrb[6].mxu1 %vm43_vm3, %v491_v46 }
 0x3c0   :  { %v1007_v56 = vpop.f32.mrb[2].mxu1 }
 0x3c1   :  { %v626_v57 = vmul.f32 0.125, %v1007_v56  ;;  %v606_v59 = vpop.f32.mrb[3].mxu1 }
 0x3c2   :  { %v625_v60 = vmul.f32 0.125, %v606_v59 }
 0x3c3   :  { %v630_v61 = vadd.f32 %v626_v57, %v493_v55 }
 0x3c4   :  { %v629_v62 = vadd.f32 %v625_v60, %v492_v58 }
 0x3c5   :  { %634 = vst.msk [vmem:[#allocation9 + $0x8] sm:$0xff] %vm43_vm3, %v630_v61 }
 0x3c6   :  { %633 = vst.msk [vmem:[#allocation9] sm:$0xff] %vm43_vm3, %v629_v62 }
 0x3c8   :  { %v1010_v0 = vpop.f32.mrb[4].mxu1 }
 0x3c9   :  { %v628_v2 = vmul.f32 0.125, %v1010_v0  ;;  %v616_v4 = vpop.f32.mrb[5].mxu1 }
 0x3ca   :  { %v627_v5 = vmul.f32 0.125, %v616_v4 }
 0x3cb   :  { %v632_v6 = vadd.f32 %v628_v2, %v495_v63 }
 0x3cc   :  { %v631_v1 = vadd.f32 %v627_v5, %v494_v3  ;;  %v714_v7 = vpop.f32.mrb[6].mxu1 }
 0x3cd   :  { %636 = vst.msk [vmem:[#allocation9 + $0x18] sm:$0xff] %vm43_vm3, %v632_v6  ;;  %722 = vxpose.xlu1.b32.start.end [1/1] (short) (narrow) %v714_v7, 16  ;;  %v1017_v8 = vpop.f32.mrb[7].mxu1  ;;  %1018 = vmatprep.subr.mxu0 %v714_v7 }
 0x3ce   :  { %719 = vst.msk [vmem:[#allocation5] sm:$0xff] %vm52_vm5, %v714_v7  ;;  %1019 = vmatpush3.msra.mxu0 %v714_v7 }
 0x3cf   :  { %635 = vst.msk [vmem:[#allocation9 + $0x10] sm:$0xff] %vm43_vm3, %v631_v1 }
 0x44d   :  { %v738_v9 = vpop.trf.xlu1 }
 0x44e   :  { %1020 = vmatprep.mubr.msk.f32.mxu0 %vm41_vm0, %v738_v9 }
 0x451   :  { %v739_v10 = vpop.trf.xlu1 }
 0x452   :  { %1021 = vmatmul.mubr.msk.f32.vlgmr.msra.gmra.mrb[8].mxu0 %vm41_vm0, %v739_v10 }
 0x453   :  { %1087 = shalt.err (!%p1084_p12)
}
 0x454   :  { %s1088_s17 = scalar_lea.hbm %s1449_s5, 128 }
 0x455   :  { %p1089_p13 = scmp.ne.s32.totalorder %s1449_s5, %s1088_s17  ;;  %p1092_p0 = scmp.lt.u32.totalorder %s1088_s17, %s1449_s5 }
 0x457   :  { %p1094_p1 = pnand %p1092_p0, %p1089_p13 }
 0x459   :  { %1097 = shalt.err (!%p1094_p1)
}
 0x45a   :  { %860 = dma.vmem_to_hbm [thread:$0]  %s858_s12, 128, %s1449_s5, [#allocation7]  }
 0x45b   :  { %s1098_s1 = scalar_lea.vmem %s879_s14, 512  ;;  %p1103_p3 = scmp.lt.s32.totalorder %s879_s14, %s879_s14 }
 0x45c   :  { %p1099_p2 = scmp.ne.s32.totalorder %s879_s14, %s1098_s1  ;;  %p1104_p4 = scmp.lt.s32.totalorder %s1098_s1, %s1098_s1 }
 0x45e   :  { %p1105_p5 = por %p1104_p4, %p1103_p3 }
 0x460   :  { %p1106_p6 = pnand %p1105_p5, %p1099_p2 }
 0x462   :  { %1109 = shalt.err (!%p1106_p6)
}
 0x463   :  { %s1110_s26 = scalar_lea.hbm %s1451_s7, 512 }
 0x464   :  { %p1111_p7 = scmp.ne.s32.totalorder %s1451_s7, %s1110_s26  ;;  %p1114_p8 = scmp.lt.u32.totalorder %s1110_s26, %s1451_s7 }
 0x466   :  { %p1116_p9 = pnand %p1114_p8, %p1111_p7 }
 0x468   :  { %1119 = shalt.err (!%p1116_p9)
}
 0x469   :  { %s1200_s5 = smov 128   ;;  %s1201_s2 = smov 8  }
 0x46a   :  { %884 = dma.vmem_to_hbm [thread:$0]  %s879_s14, 512, %s1451_s7, [#allocation10], %s1200_s5, %s1200_s5, %s1201_s2  }
 0x46b   :  { %s1202_s11 = smov [#allocation5]   ;;  %s1203_s12 = smov [#allocation8]  }
 0x46c   :  { %s847_s3 = sshll.u32 %s1202_s11, 4  ;;  %s866_s13 = sshll.u32 %s1203_s12, 4  ;;  %s848_s3 = int_to_ptr.vmem [resolvable:$true] %s847_s3  ;;  %s1393_s13 = int_to_ptr.vmem [resolvable:$true] %s866_s13 }
 0x46d   :  { %s1120_s15 = scalar_lea.vmem %s848_s3, 128  ;;  %p1125_p11 = scmp.lt.s32.totalorder %s848_s3, %s848_s3 }
 0x46e   :  { %p1121_p10 = scmp.ne.s32.totalorder %s848_s3, %s1120_s15  ;;  %p1126_p12 = scmp.lt.s32.totalorder %s1120_s15, %s1120_s15 }
 0x470   :  { %p1127_p13 = por %p1126_p12, %p1125_p11 }
 0x472   :  { %p1128_p0 = pnand %p1127_p13, %p1121_p10 }
 0x474   :  { %1131 = shalt.err (!%p1128_p0)
}
 0x475   :  { %s1132_s17 = scalar_lea.hbm %s1448_s4, 128 }
 0x476   :  { %p1133_p1 = scmp.ne.s32.totalorder %s1448_s4, %s1132_s17  ;;  %p1136_p2 = scmp.lt.u32.totalorder %s1132_s17, %s1448_s4 }
 0x478   :  { %p1138_p3 = pnand %p1136_p2, %p1133_p1 }
 0x47a   :  { %1141 = shalt.err (!%p1138_p3)
}
 0x47b   :  { %850 = dma.vmem_to_hbm [thread:$0]  %s848_s3, 128, %s1448_s4, [#allocation4]  }
 0x47c   :  { %s1142_s22 = scalar_lea.vmem %s1393_s13, 512  ;;  %p1147_p5 = scmp.lt.s32.totalorder %s1393_s13, %s1393_s13 }
 0x47d   :  { %p1143_p4 = scmp.ne.s32.totalorder %s1393_s13, %s1142_s22  ;;  %p1148_p6 = scmp.lt.s32.totalorder %s1142_s22, %s1142_s22 }
 0x47f   :  { %p1149_p7 = por %p1148_p6, %p1147_p5 }
 0x481   :  { %p1150_p8 = pnand %p1149_p7, %p1143_p4 }
 0x483   :  { %1153 = shalt.err (!%p1150_p8)
}
 0x484   :  { %s1154_s24 = scalar_lea.hbm %s1450_s6, 512 }
 0x485   :  { %p1155_p9 = scmp.ne.s32.totalorder %s1450_s6, %s1154_s24  ;;  %p1158_p10 = scmp.lt.u32.totalorder %s1154_s24, %s1450_s6 }
 0x487   :  { %p1160_p11 = pnand %p1158_p10, %p1155_p9 }
 0x489   :  { %1163 = shalt.err (!%p1160_p11)
}
 0x48a   :  { %872 = dma.vmem_to_hbm [thread:$0]  %s1393_s13, 512, %s1450_s6, [#allocation7], %s1200_s5, %s1200_s5, %s1201_s2   ;;  %v721_v11 = vld [vmem:[#allocation11 + $0x8] sm:$0xff]  ;;  %v720_v14 = vld [vmem:[#allocation11] sm:$0xff] }
 0x48b   :  { %s1204_s30 = smov [#allocation11]  }
 0x48c   :  { %s890_s9 = sshll.u32 %s1204_s30, 4  ;;  %s891_s9 = int_to_ptr.vmem [resolvable:$true] %s890_s9 }
 0x48d   :  { %s1164_s10 = scalar_lea.vmem %s891_s9, 256  ;;  %p1169_p13 = scmp.lt.s32.totalorder %s891_s9, %s891_s9 }
 0x48e   :  { %p1165_p12 = scmp.ne.s32.totalorder %s891_s9, %s1164_s10  ;;  %p1170_p0 = scmp.lt.s32.totalorder %s1164_s10, %s1164_s10 }
 0x490   :  { %p1171_p1 = por %p1170_p0, %p1169_p13 }
 0x492   :  { %p1172_p2 = pnand %p1171_p1, %p1165_p12 }
 0x525   :  { %v1022_v12 = vpop.f32.mrb[8].mxu0 }
 0x526   :  { %v836_v13 = vmul.f32 0.125, %v1022_v12  ;;  %v826_v15 = vpop.f32.mrb[9].mxu0 }
 0x527   :  { %v835_v16 = vmul.f32 0.125, %v826_v15 }
 0x528   :  { %v838_v17 = vadd.f32 %v836_v13, %v721_v11 }
 0x529   :  { %v837_v18 = vadd.f32 %v835_v16, %v720_v14 }
 0x52a   :  { %840 = vst.msk [vmem:[#allocation11 + $0x8] sm:$0xff] %vm52_vm5, %v838_v17 }
 0x52b   :  { %839 = vst.msk [vmem:[#allocation11] sm:$0xff] %vm52_vm5, %v837_v18 }
 0x52c   :  { %1175 = shalt.err (!%p1172_p2)
}
 0x52d   :  { %s1176_s3 = scalar_lea.hbm %s1452_s8, 256 }
 0x52e   :  { %p1177_p3 = scmp.ne.s32.totalorder %s1452_s8, %s1176_s3  ;;  %p1180_p4 = scmp.lt.u32.totalorder %s1176_s3, %s1452_s8 }
 0x530   :  { %p1182_p5 = pnand %p1180_p4, %p1177_p3 }
 0x532   :  { %1185 = shalt.err (!%p1182_p5)
}
 0x533   :  { %896 = dma.vmem_to_hbm [thread:$0]  %s891_s9, 256, %s1452_s8, [#allocation10], %s1200_s5, %s1200_s5, %s1201_s2  }
 0x534   :  { %1188 = dma.done.wait [#allocation4], 128  }
 0x535   :  { %1189 = vsyncadd [#allocation4], 4294967168 }
 0x536   :  { %1190 = dma.done.wait [#allocation7], 640  }
 0x537   :  { %1191 = vsyncadd [#allocation7], 4294966656 }
 0x538   :  { %1192 = dma.done.wait [#allocation10], 768  }
 0x539   :  { %1193 = vsyncadd [#allocation10], 4294966528 }
 0x53a   :  { %912 = vsyncpa [#allocation3], 1 }
 0x53b   :  { %913 = vsyncpa [#allocation4], 1 }
 0x53c   :  { %914 = vsyncpa [#allocation7], 1 }
 0x53d   :  { %915 = vsyncpa [#allocation10], 1 }

</bundles_post_ra>
